<compile_context>
chip_gen: v7x
topology: tpu7x:2x2x1
jax: 0.10.0
libtpu: 0.0.40
codegen_flags: <defaults>
</compile_context>

<pallas_src>
import jax
import jax.numpy as jnp
from jax.experimental import pallas as pl
from jax.experimental.pallas import tpu as pltpu


def _mlp_kernel(x_ref, w1_ref, b1_ref, w2_ref, b2_ref, o_ref):
    # Cast the streamed x tile to the compute dtype on the VPU; the wrapper
    # never touches x, so x is read from HBM exactly once.
    x = x_ref[...].astype(w1_ref.dtype)
    # fc1 + ReLU: MXU matmul with f32 accumulation; bias/ReLU in f32 on VPU.
    h = jnp.dot(x, w1_ref[...], preferred_element_type=jnp.float32)
    h = jnp.maximum(h + b1_ref[...], 0.0)                      # (tb, 512)
    # out head: cast activations back to the weight dtype for the MXU.
    y = jnp.dot(h.astype(w2_ref.dtype), w2_ref[...],
                preferred_element_type=jnp.float32)
    o_ref[...] = (y + b2_ref[...]).astype(o_ref.dtype)          # (tb, N)


def prepare_params(w1, b1, w2, b2, *, compute_dtype=jnp.bfloat16):
    """One-time weight preparation (hoisted out of the per-call path).

    Weights go to the MXU compute dtype (bf16 by default); biases stay f32
    because they are added to the f32 accumulator inside the kernel.
    """
    return (w1.astype(compute_dtype), b1.astype(jnp.float32),
            w2.astype(compute_dtype), b2.astype(jnp.float32))


def _choose_batch_tile(B, *, max_tile=2048, min_steps=2):
    """Batch tile: big enough to amortize per-grid-step overhead, small enough
    to keep >= min_steps grid steps (v7x 2-TC sharding) when B allows it."""
    if B <= 16:
        return B                       # single block == full dim (always legal)
    steps = max(min_steps, pl.cdiv(B, max_tile))
    tb = pl.cdiv(pl.cdiv(B, steps), 16) * 16       # multiple of 16 rows
    return min(tb, max_tile)


def fc_dynamics_state(x, w1, b1, w2, b2, *, out_dtype=None, tile_b=None):
    """FCDynamicsState forward.

    x : (B, hidden_dim + action_space)
    w1: (hidden_dim + action_space, 512), b1: (1, 512)
    w2: (512, hidden_dim),                b2: (1, hidden_dim)
    -> (B, hidden_dim)

    Pass weights through prepare_params() once (bf16 production path, f32 for
    strict numerical checks); x is cast in-kernel.
    """
    B, K = x.shape
    K1, H = w1.shape                    # H = 512
    H2, N = w2.shape                    # N = hidden_dim
    assert K1 == K and H2 == H and b1.shape == (1, H) and b2.shape == (1, N)

    if out_dtype is None:
        out_dtype = x.dtype
    tb = tile_b if tile_b is not None else _choose_batch_tile(B)
    grid = (pl.cdiv(B, tb),)

    flops = 2 * B * (K * H + H * N)
    bytes_accessed = (x.size * x.dtype.itemsize
                      + w1.size * w1.dtype.itemsize
                      + b1.size * b1.dtype.itemsize
                      + w2.size * w2.dtype.itemsize
                      + b2.size * b2.dtype.itemsize
                      + B * N * jnp.dtype(out_dtype).itemsize)

    return pl.pallas_call(
        _mlp_kernel,
        out_shape=jax.ShapeDtypeStruct((B, N), out_dtype),
        grid=grid,
        in_specs=[
            pl.BlockSpec((tb, K), lambda i: (i, 0)),     # x tile (streamed)
            pl.BlockSpec((K, H), lambda i: (0, 0)),      # w1 (VMEM-resident)
            pl.BlockSpec((1, H), lambda i: (0, 0)),      # b1 (VMEM-resident)
            pl.BlockSpec((H, N), lambda i: (0, 0)),      # w2 (VMEM-resident)
            pl.BlockSpec((1, N), lambda i: (0, 0)),      # b2 (VMEM-resident)
        ],
        out_specs=pl.BlockSpec((tb, N), lambda i: (i, 0)),
        compiler_params=pltpu.CompilerParams(
            dimension_semantics=("parallel",),
        ),
        cost_estimate=pl.CostEstimate(
            flops=flops, transcendentals=0, bytes_accessed=bytes_accessed),
    )(x, w1, b1, w2, b2)


def init_params(key, input_dim, hidden_dim, dtype=jnp.float32):
    """PyTorch nn.Linear default init: U(-1/sqrt(fan_in), +1/sqrt(fan_in))."""
    k1, k2, k3, k4 = jax.random.split(key, 4)
    bound1 = 1.0 / jnp.sqrt(jnp.asarray(input_dim, jnp.float32))
    bound2 = 1.0 / jnp.sqrt(jnp.asarray(512.0, jnp.float32))
    w1 = jax.random.uniform(k1, (input_dim, 512), dtype, -bound1, bound1)
    b1 = jax.random.uniform(k2, (1, 512), dtype, -bound1, bound1)
    w2 = jax.random.uniform(k3, (512, hidden_dim), dtype, -bound2, bound2)
    b2 = jax.random.uniform(k4, (1, hidden_dim), dtype, -bound2, bound2)
    return w1, b1, w2, b2


if __name__ == "__main__":
    key = jax.random.PRNGKey(0)
    k_x, k_p = jax.random.split(key)

    batch = 8
    hidden_dim = 32          # module's hidden_dim (also the output width)
    action_space = 8
    input_dim = hidden_dim + action_space   # fc1 input features = 40

    x = jax.random.normal(k_x, (batch, input_dim), jnp.float32)
    w1, b1, w2, b2 = init_params(k_p, input_dim, hidden_dim)

    ref = jnp.maximum(x @ w1 + b1, 0.0) @ w2 + b2

    # f32 compute path: strict numerical check.
    p_f32 = prepare_params(w1, b1, w2, b2, compute_dtype=jnp.float32)
    out_f32 = fc_dynamics_state(x, *p_f32)
    out_f32 = jax.block_until_ready(out_f32)
    assert out_f32.shape == (batch, hidden_dim)
    assert out_f32.dtype == jnp.float32
    assert jnp.allclose(out_f32, ref, atol=1e-5, rtol=1e-5)

    # bf16 production path (weights pre-cast once, x cast in-kernel): loose check.
    p_bf16 = prepare_params(w1, b1, w2, b2)
    out_bf16 = fc_dynamics_state(x, *p_bf16)
    out_bf16 = jax.block_until_ready(out_bf16)
    assert out_bf16.shape == (batch, hidden_dim)
    assert jnp.allclose(out_bf16, ref, atol=5e-2, rtol=5e-2)

    print("KERNEL_OK")
</pallas_src>

<mosaic_0001>
module attributes {stable_mosaic.version = 11 : i64} {
  func.func @_mlp_kernel(%arg0: i32, %arg1: memref<8x40xf32, #tpu.memory_space<vmem>>, %arg2: memref<40x512xf32, #tpu.memory_space<vmem>>, %arg3: memref<1x512xf32, #tpu.memory_space<vmem>>, %arg4: memref<512x32xf32, #tpu.memory_space<vmem>>, %arg5: memref<1x32xf32, #tpu.memory_space<vmem>>, %arg6: memref<8x32xf32, #tpu.memory_space<vmem>>) attributes {dimension_semantics = [#tpu.dimension_semantics<parallel>], iteration_bounds = array<i64: 1>, scalar_prefetch = 0 : i64, scratch_operands = 0 : i64, tpu.core_type = #tpu.core_type<tc>, window_params = [{transform_indices = @transform_0, window_bounds = array<i64: 8, 40>}, {pipeline_mode = #tpu.pipeline_mode<synchronous>, transform_indices = @transform_1, window_bounds = array<i64: 40, 512>}, {pipeline_mode = #tpu.pipeline_mode<synchronous>, transform_indices = @transform_2, window_bounds = array<i64: 1, 512>}, {pipeline_mode = #tpu.pipeline_mode<synchronous>, transform_indices = @transform_3, window_bounds = array<i64: 512, 32>}, {pipeline_mode = #tpu.pipeline_mode<synchronous>, transform_indices = @transform_4, window_bounds = array<i64: 1, 32>}, {transform_indices = @transform_5, window_bounds = array<i64: 8, 32>}]} {
    %c0 = arith.constant 0 : index
    %c0_0 = arith.constant 0 : index
    %0 = vector.load %arg1[%c0, %c0_0] : memref<8x40xf32, #tpu.memory_space<vmem>>, vector<8x40xf32>
    %c0_1 = arith.constant 0 : index
    %c0_2 = arith.constant 0 : index
    %1 = vector.load %arg2[%c0_1, %c0_2] : memref<40x512xf32, #tpu.memory_space<vmem>>, vector<40x512xf32>
    %cst = arith.constant dense<0.000000e+00> : vector<8x512xf32>
    %2 = tpu.matmul %0, %1, %cst {dimension_numbers = #tpu.dot_dimension_numbers<[1], [0], [0], [1], [0, 0, 1, 1], [], []>} : vector<8x40xf32>, vector<40x512xf32>, vector<8x512xf32> -> vector<8x512xf32>
    %c0_3 = arith.constant 0 : index
    %c0_4 = arith.constant 0 : index
    %3 = vector.load %arg3[%c0_3, %c0_4] : memref<1x512xf32, #tpu.memory_space<vmem>>, vector<1x512xf32>
    %4 = vector.broadcast %3 : vector<1x512xf32> to vector<8x512xf32>
    %5 = arith.addf %2, %4 : vector<8x512xf32>
    %cst_5 = arith.constant 0.000000e+00 : f32
    %6 = vector.broadcast %cst_5 : f32 to vector<8x512xf32>
    %7 = arith.maximumf %5, %6 : vector<8x512xf32>
    %c0_6 = arith.constant 0 : index
    %c0_7 = arith.constant 0 : index
    %8 = vector.load %arg4[%c0_6, %c0_7] : memref<512x32xf32, #tpu.memory_space<vmem>>, vector<512x32xf32>
    %cst_8 = arith.constant dense<0.000000e+00> : vector<8x32xf32>
    %9 = tpu.matmul %7, %8, %cst_8 {dimension_numbers = #tpu.dot_dimension_numbers<[1], [0], [0], [1], [0, 0, 1, 1], [], []>} : vector<8x512xf32>, vector<512x32xf32>, vector<8x32xf32> -> vector<8x32xf32>
    %c0_9 = arith.constant 0 : index
    %c0_10 = arith.constant 0 : index
    %10 = vector.load %arg5[%c0_9, %c0_10] : memref<1x32xf32, #tpu.memory_space<vmem>>, vector<1x32xf32>
    %11 = vector.broadcast %10 : vector<1x32xf32> to vector<8x32xf32>
    %12 = arith.addf %9, %11 : vector<8x32xf32>
    %c0_11 = arith.constant 0 : index
    %c0_12 = arith.constant 0 : index
    %13 = vector.load %arg6[%c0_11, %c0_12] : memref<8x32xf32, #tpu.memory_space<vmem>>, vector<8x32xf32>
    tpu.vector_store %arg6[%c0_11, %c0_12], %12 {strides = array<i32>} : memref<8x32xf32, #tpu.memory_space<vmem>>, vector<8x32xf32>,
    return
  }
  func.func @transform_0(%arg0: i32) -> (i32, i32) {
    %c0_i32 = arith.constant 0 : i32
    %c0_i32_0 = arith.constant 0 : i32
    return %arg0, %c0_i32 : i32, i32
  }
  func.func @transform_1(%arg0: i32) -> (i32, i32) {
    %c0_i32 = arith.constant 0 : i32
    %c0_i32_0 = arith.constant 0 : i32
    %c0_i32_1 = arith.constant 0 : i32
    return %c0_i32, %c0_i32_0 : i32, i32
  }
  func.func @transform_2(%arg0: i32) -> (i32, i32) {
    %c0_i32 = arith.constant 0 : i32
    %c0_i32_0 = arith.constant 0 : i32
    %c0_i32_1 = arith.constant 0 : i32
    return %c0_i32, %c0_i32_0 : i32, i32
  }
  func.func @transform_3(%arg0: i32) -> (i32, i32) {
    %c0_i32 = arith.constant 0 : i32
    %c0_i32_0 = arith.constant 0 : i32
    %c0_i32_1 = arith.constant 0 : i32
    return %c0_i32, %c0_i32_0 : i32, i32
  }
  func.func @transform_4(%arg0: i32) -> (i32, i32) {
    %c0_i32 = arith.constant 0 : i32
    %c0_i32_0 = arith.constant 0 : i32
    %c0_i32_1 = arith.constant 0 : i32
    return %c0_i32, %c0_i32_0 : i32, i32
  }
  func.func @transform_5(%arg0: i32) -> (i32, i32) {
    %c0_i32 = arith.constant 0 : i32
    %c0_i32_0 = arith.constant 0 : i32
    return %arg0, %c0_i32 : i32, i32
  }
}

</mosaic_0001>

<bundles_post_ra>
// kernel: tpu_custom_call.1
= control target key start
LH: loop header
LB: loop body
LE: loop exit
PB: predicated region body
PF: predicated region fallthrough
CT: control target
= control target key end

     0   :  { %v620_v7 = vmov 0.0   ;;  %vm64_vm0 = vcmask 326656   ;;  %s927_s0 = inlined_call_operand.vmem [shape: f32[8,40], index: 0, kind: input, shape index: {}]   ;;  %s928_s1 = inlined_call_operand.vmem [shape: f32[40,512], index: 1, kind: input, shape index: {}]   ;;  %s929_s2 = inlined_call_operand.vmem [shape: f32[1,512], index: 2, kind: input, shape index: {}]   ;;  %s930_s3 = inlined_call_operand.vmem [shape: f32[512,32], index: 3, kind: input, shape index: {}]   ;;  %s931_s4 = inlined_call_operand.vmem [shape: f32[1,32], index: 4, kind: input, shape index: {}]   ;;  %s932_s5 = inlined_call_operand.hbm [shape: f32[8,32], index: 5, kind: output, shape index: {}]  }
   0x1   :  { %v23_v0 = vld [vmem:[%s928_s1 + $0x8] sm:$0xff]  ;;  %v25_v2 = vld [vmem:[%s928_s1 + $0x18] sm:$0xff]  ;;  %v22_v5 = vld [vmem:[%s928_s1] sm:$0xff]  ;;  %132 = vmatprep.mubr.f32.mxu0 %v620_v7  ;;  %203 = vmatprep.mubr.f32.mxu1 %v620_v7 }
   0x2   :  { %v27_v1 = vld [vmem:[%s928_s1 + $0x28] sm:$0xff]  ;;  %v29_v4 = vld [vmem:[%s928_s1 + $0x38] sm:$0xff]  ;;  %v26_v6 = vld [vmem:[%s928_s1 + $0x20] sm:$0xff] }
   0x3   :  { %v514_v3 = vpack.c.bf16 %v27_v1, %v23_v0  ;;  %v522_v8 = vpack.c.bf16 %v29_v4, %v25_v2  ;;  %v516_v9 = vpack.c.bf16 %v26_v6, %v22_v5  ;;  %v24_v10 = vld [vmem:[%s928_s1 + $0x10] sm:$0xff]  ;;  %v31_v12 = vld [vmem:[%s928_s1 + $0x48] sm:$0xff]  ;;  %v33_v15 = vld [vmem:[%s928_s1 + $0x58] sm:$0xff] }
   0x4   :  { %v28_v11 = vld [vmem:[%s928_s1 + $0x30] sm:$0xff]  ;;  %v35_v14 = vld [vmem:[%s928_s1 + $0x68] sm:$0xff]  ;;  %v37_v16 = vld [vmem:[%s928_s1 + $0x78] sm:$0xff] }
   0x5   :  { %515 = vmatprep.subr.bf16.mxu0 %v514_v3  ;;  %v524_v13 = vpack.c.bf16 %v28_v11, %v24_v10  ;;  %523 = vmatprep.subr.bf16.mxu1 %v522_v8  ;;  %v518_v17 = vpack.c.bf16 %v35_v14, %v31_v12  ;;  %v526_v18 = vpack.c.bf16 %v37_v16, %v33_v15  ;;  %v30_v19 = vld [vmem:[%s928_s1 + $0x40] sm:$0xff]  ;;  %v32_v21 = vld [vmem:[%s928_s1 + $0x50] sm:$0xff]  ;;  %v39_v25 = vld [vmem:[%s928_s1 + $0x88] sm:$0xff] }
   0x6   :  { %517 = vmatpush1.bf16.msra.mxu0 %v516_v9  ;;  %v34_v20 = vld [vmem:[%s928_s1 + $0x60] sm:$0xff]  ;;  %v36_v23 = vld [vmem:[%s928_s1 + $0x70] sm:$0xff]  ;;  %v41_v26 = vld [vmem:[%s928_s1 + $0x98] sm:$0xff] }
   0x7   :  { %525 = vmatpush1.bf16.msra.mxu1 %v524_v13  ;;  %v520_v22 = vpack.c.bf16 %v34_v20, %v30_v19  ;;  %519 = vmatprep.subr.bf16.mxu0 %v518_v17  ;;  %v528_v24 = vpack.c.bf16 %v36_v23, %v32_v21  ;;  %v38_v27 = vld [vmem:[%s928_s1 + $0x80] sm:$0xff]  ;;  %v231_v29 = vld [vmem:[%s930_s3 + $0x88] sm:$0xff]  ;;  %v40_v31 = vld [vmem:[%s928_s1 + $0x90] sm:$0xff] }
   0x8   :  { %527 = vmatprep.subr.bf16.mxu1 %v526_v18  ;;  %v230_v28 = vld [vmem:[%s930_s3 + $0x80] sm:$0xff]  ;;  %v263_v33 = vld [vmem:[%s930_s3 + $0x188] sm:$0xff]  ;;  %v232_v38 = vld [vmem:[%s930_s3 + $0x90] sm:$0xff] }
   0x9   :  { %v262_v30 = vld [vmem:[%s930_s3 + $0x180] sm:$0xff]  ;;  %v215_v35 = vld [vmem:[%s930_s3 + $0x8] sm:$0xff]  ;;  %v530_v39 = vpack.c.bf16 %v231_v29, %v230_v28  ;;  %v233_v40 = vld [vmem:[%s930_s3 + $0x98] sm:$0xff] }
   0xa   :  { %521 = vmatpush1.bf16.msra.mxu0 %v520_v22  ;;  %v21_v32 = vld [vmem:[%s927_s0] sm:$0xff]  ;;  %v247_v37 = vld [vmem:[%s930_s3 + $0x108] sm:$0xff]  ;;  %v264_v41 = vld [vmem:[%s930_s3 + $0x190] sm:$0xff]  ;;  %v562_v43 = vpack.c.bf16 %v263_v33, %v262_v30  ;;  %v534_v46 = vpack.c.bf16 %v233_v40, %v232_v38 }
   0xb   :  { %v214_v34 = vld [vmem:[%s930_s3] sm:$0xff]  ;;  %529 = vmatpush1.bf16.msra.mxu1 %v528_v24  ;;  %76 = vmatprep.subr.mxu0 %v39_v25  ;;  %v265_v42 = vld [vmem:[%s930_s3 + $0x198] sm:$0xff]  ;;  %v216_v47 = vld [vmem:[%s930_s3 + $0x10] sm:$0xff] }
   0xc   :  { %v246_v36 = vld [vmem:[%s930_s3 + $0x100] sm:$0xff]  ;;  %147 = vmatprep.subr.mxu1 %v41_v26  ;;  %v532_v44 = vpack.c.bf16 %v215_v35, %v214_v34  ;;  %v217_v48 = vld [vmem:[%s930_s3 + $0x18] sm:$0xff]  ;;  %v248_v49 = vld [vmem:[%s930_s3 + $0x110] sm:$0xff]  ;;  %v566_v50 = vpack.c.bf16 %v265_v42, %v264_v41 }
   0xd   :  { %v564_v45 = vpack.c.bf16 %v247_v37, %v246_v36  ;;  %v249_v51 = vld [vmem:[%s930_s3 + $0x118] sm:$0xff]  ;;  %v234_v52 = vld [vmem:[%s930_s3 + $0xa0] sm:$0xff]  ;;  %v235_v53 = vld [vmem:[%s930_s3 + $0xa8] sm:$0xff]  ;;  %v536_v56 = vpack.c.bf16 %v217_v48, %v216_v47 }
   0xe   :  { %77 = vmatpush1.msra.mxu0 %v38_v27  ;;  %v266_v54 = vld [vmem:[%s930_s3 + $0x1a0] sm:$0xff]  ;;  %v267_v55 = vld [vmem:[%s930_s3 + $0x1a8] sm:$0xff]  ;;  %v568_v57 = vpack.c.bf16 %v249_v51, %v248_v49  ;;  %v538_v58 = vpack.c.bf16 %v235_v53, %v234_v52  ;;  %v236_v0 = vld [vmem:[%s930_s3 + $0xb0] sm:$0xff] }
   0xf   :  { %148 = vmatpush1.msra.mxu1 %v40_v31  ;;  %441 = vmatmul.mubr.msk.f32.vlgmr.msra.gmra.mrb[0].mxu0 %vm64_vm0, %v21_v32  ;;  %v218_v59 = vld [vmem:[%s930_s3 + $0x20] sm:$0xff]  ;;  %v219_v60 = vld [vmem:[%s930_s3 + $0x28] sm:$0xff]  ;;  %v570_v62 = vpack.c.bf16 %v267_v55, %v266_v54  ;;  %v237_v1 = vld [vmem:[%s930_s3 + $0xb8] sm:$0xff] }
  0x10   :  { %442 = vmatmul.mubr.msk.f32.vlgmr.msra.gmra.mrb[0].mxu1 %vm64_vm0, %v21_v32  ;;  %531 = vmatprep.subr.bf16.mxu0 %v530_v39  ;;  %v250_v61 = vld [vmem:[%s930_s3 + $0x120] sm:$0xff]  ;;  %v251_v63 = vld [vmem:[%s930_s3 + $0x128] sm:$0xff]  ;;  %v268_v2 = vld [vmem:[%s930_s3 + $0x1b0] sm:$0xff]  ;;  %v540_v4 = vpack.c.bf16 %v219_v60, %v218_v59  ;;  %v542_v6 = vpack.c.bf16 %v237_v1, %v236_v0 }
  0x11   :  { %563 = vmatprep.subr.bf16.mxu1 %v562_v43  ;;  %533 = vmatpush3.bf16.msra.mxu0 %v532_v44  ;;  %v269_v3 = vld [vmem:[%s930_s3 + $0x1b8] sm:$0xff]  ;;  %v572_v5 = vpack.c.bf16 %v251_v63, %v250_v61  ;;  %v220_v7 = vld [vmem:[%s930_s3 + $0x30] sm:$0xff]  ;;  %v238_v12 = vld [vmem:[%s930_s3 + $0xc0] sm:$0xff] }
  0x12   :  { %565 = vmatpush3.bf16.msra.mxu1 %v564_v45  ;;  %535 = vmatprep.subr.bf16.mxu0 %v534_v46  ;;  %v221_v8 = vld [vmem:[%s930_s3 + $0x38] sm:$0xff]  ;;  %v252_v9 = vld [vmem:[%s930_s3 + $0x130] sm:$0xff]  ;;  %v574_v10 = vpack.c.bf16 %v269_v3, %v268_v2  ;;  %v239_v13 = vld [vmem:[%s930_s3 + $0xc8] sm:$0xff] }
  0x13   :  { %567 = vmatprep.subr.bf16.mxu1 %v566_v50  ;;  %v253_v11 = vld [vmem:[%s930_s3 + $0x138] sm:$0xff]  ;;  %v270_v14 = vld [vmem:[%s930_s3 + $0x1c0] sm:$0xff]  ;;  %v271_v15 = vld [vmem:[%s930_s3 + $0x1c8] sm:$0xff]  ;;  %v544_v16 = vpack.c.bf16 %v221_v8, %v220_v7  ;;  %v546_v19 = vpack.c.bf16 %v239_v13, %v238_v12 }
  0x14   :  { %v222_v17 = vld [vmem:[%s930_s3 + $0x40] sm:$0xff]  ;;  %v576_v18 = vpack.c.bf16 %v253_v11, %v252_v9  ;;  %v223_v20 = vld [vmem:[%s930_s3 + $0x48] sm:$0xff] }
  0x15   :  { %537 = vmatpush3.bf16.msra.mxu0 %v536_v56  ;;  %v254_v21 = vld [vmem:[%s930_s3 + $0x140] sm:$0xff] }
  0x16   :  { %569 = vmatpush3.bf16.msra.mxu1 %v568_v57  ;;  %539 = vmatprep.subr.bf16.mxu0 %v538_v58 }
  0x17   :  { %571 = vmatprep.subr.bf16.mxu1 %v570_v62 }
  0x19   :  { %541 = vmatpush3.bf16.msra.mxu0 %v540_v4 }
  0x1a   :  { %573 = vmatpush3.bf16.msra.mxu1 %v572_v5  ;;  %543 = vmatprep.subr.bf16.mxu0 %v542_v6 }
  0x1b   :  { %10 = vsyncpa [#allocation3], 0  ;;  %575 = vmatprep.subr.bf16.mxu1 %v574_v10  ;;  %v578_v22 = vpack.c.bf16 %v271_v15, %v270_v14  ;;  %v255_v23 = vld [vmem:[%s930_s3 + $0x148] sm:$0xff]  ;;  %v240_v24 = vld [vmem:[%s930_s3 + $0xd0] sm:$0xff]  ;;  %v548_v28 = vpack.c.bf16 %v223_v20, %v222_v17  ;;  %v44_v62 = vlaneseq  ;;  %s621_s30 = smov [#allocation2]   ;;  %vm425_vm1 = vcmask 261120  }
  0x1c   :  { %v241_v25 = vld [vmem:[%s930_s3 + $0xd8] sm:$0xff]  ;;  %v272_v26 = vld [vmem:[%s930_s3 + $0x1d0] sm:$0xff]  ;;  %v580_v29 = vpack.c.bf16 %v255_v23, %v254_v21  ;;  %v242_v36 = vld [vmem:[%s930_s3 + $0xe0] sm:$0xff]  ;;  %s433_s6 = sshll.u32 %s621_s30, 4  ;;  %s434_s6 = int_to_ptr.vmem [resolvable:$true] %s433_s6 }
  0x1d   :  { %v273_v27 = vld [vmem:[%s930_s3 + $0x1d8] sm:$0xff]  ;;  %545 = vmatpush3.bf16.msra.mxu0 %v544_v16  ;;  %v550_v30 = vpack.c.bf16 %v241_v25, %v240_v24  ;;  %v224_v31 = vld [vmem:[%s930_s3 + $0x50] sm:$0xff]  ;;  %v243_v37 = vld [vmem:[%s930_s3 + $0xe8] sm:$0xff]  ;;  %v45_v63 = vshrl.u32 %v44_v62, 7  ;;  %s596_s7 = scalar_lea.vmem %s434_s6, 128  ;;  %p601_p1 = scmp.lt.s32.totalorder %s434_s6, %s434_s6 }
  0x1e   :  { %577 = vmatpush3.bf16.msra.mxu1 %v576_v18  ;;  %547 = vmatprep.subr.bf16.mxu0 %v546_v19  ;;  %v225_v32 = vld [vmem:[%s930_s3 + $0x58] sm:$0xff]  ;;  %v256_v33 = vld [vmem:[%s930_s3 + $0x150] sm:$0xff]  ;;  %v582_v34 = vpack.c.bf16 %v273_v27, %v272_v26  ;;  %v274_v38 = vld [vmem:[%s930_s3 + $0x1e0] sm:$0xff]  ;;  %v554_v42 = vpack.c.bf16 %v243_v37, %v242_v36  ;;  %p597_p0 = scmp.ne.s32.totalorder %s434_s6, %s596_s7  ;;  %p602_p2 = scmp.lt.s32.totalorder %s596_s7, %s596_s7 }
  0x1f   :  { %579 = vmatprep.subr.bf16.mxu1 %v578_v22  ;;  %v257_v35 = vld [vmem:[%s930_s3 + $0x158] sm:$0xff]  ;;  %v275_v39 = vld [vmem:[%s930_s3 + $0x1e8] sm:$0xff]  ;;  %v552_v40 = vpack.c.bf16 %v225_v32, %v224_v31  ;;  %v226_v44 = vld [vmem:[%s930_s3 + $0x60] sm:$0xff]  ;;  %v46_v0 = vsub.s32 0, %v45_v63  ;;  %v54_v2 = vsub.s32 2, %v45_v63  ;;  %v50_v3 = vsub.s32 1, %v45_v63 }
  0x20   :  { %v584_v41 = vpack.c.bf16 %v257_v35, %v256_v33  ;;  %v586_v43 = vpack.c.bf16 %v275_v39, %v274_v38  ;;  %v227_v45 = vld [vmem:[%s930_s3 + $0x68] sm:$0xff]  ;;  %v258_v46 = vld [vmem:[%s930_s3 + $0x160] sm:$0xff]  ;;  %v244_v50 = vld [vmem:[%s930_s3 + $0xf0] sm:$0xff]  ;;  %v58_v4 = vsub.s32 3, %v45_v63  ;;  %p603_p3 = por %p602_p2, %p601_p1 }
  0x21   :  { %549 = vmatpush3.bf16.msra.mxu0 %v548_v28  ;;  %v556_v47 = vpack.c.bf16 %v227_v45, %v226_v44  ;;  %v259_v48 = vld [vmem:[%s930_s3 + $0x168] sm:$0xff]  ;;  %v245_v51 = vld [vmem:[%s930_s3 + $0xf8] sm:$0xff]  ;;  %v276_v52 = vld [vmem:[%s930_s3 + $0x1f0] sm:$0xff] }
  0x22   :  { %581 = vmatpush3.bf16.msra.mxu1 %v580_v29  ;;  %551 = vmatprep.subr.bf16.mxu0 %v550_v30  ;;  %v588_v49 = vpack.c.bf16 %v259_v48, %v258_v46  ;;  %v558_v53 = vpack.c.bf16 %v245_v51, %v244_v50  ;;  %v277_v54 = vld [vmem:[%s930_s3 + $0x1f8] sm:$0xff]  ;;  %v228_v55 = vld [vmem:[%s930_s3 + $0x70] sm:$0xff]  ;;  %v42_v1 = vld [vmem:[%s929_s2] sm:$0xf]  ;;  %p604_p4 = pnand %p603_p3, %p597_p0 }
  0x23   :  { %583 = vmatprep.subr.bf16.mxu1 %v582_v34  ;;  %v229_v56 = vld [vmem:[%s930_s3 + $0x78] sm:$0xff]  ;;  %v590_v57 = vpack.c.bf16 %v277_v54, %v276_v52  ;;  %v260_v59 = vld [vmem:[%s930_s3 + $0x170] sm:$0xff]  ;;  %v47_v5 = vrot.slane %v42_v1, %v46_v0  ;;  %v55_v6 = vrot.slane %v42_v1, %v54_v2  ;;  %v51_v7 = vrot.slane %v42_v1, %v50_v3  ;;  %v443_v23 = vld [vmem:[%s931_s4] ss:$0 sm:$0xff] }
  0x24   :  { %v560_v58 = vpack.c.bf16 %v229_v56, %v228_v55  ;;  %v261_v60 = vld [vmem:[%s930_s3 + $0x178] sm:$0xff]  ;;  %v59_v8 = vrot.slane %v42_v1, %v58_v4 }
  0x25   :  { %553 = vmatpush3.bf16.msra.mxu0 %v552_v40  ;;  %v592_v61 = vpack.c.bf16 %v261_v60, %v260_v59 }
  0x26   :  { %585 = vmatpush3.bf16.msra.mxu1 %v584_v41  ;;  %555 = vmatprep.subr.bf16.mxu0 %v554_v42 }
  0x27   :  { %587 = vmatprep.subr.bf16.mxu1 %v586_v43 }
  0x29   :  { %557 = vmatpush3.bf16.msra.mxu0 %v556_v47 }
  0x2a   :  { %589 = vmatpush3.bf16.msra.mxu1 %v588_v49  ;;  %559 = vmatprep.subr.bf16.mxu0 %v558_v53 }
  0x2b   :  { %591 = vmatprep.subr.bf16.mxu1 %v590_v57 }
  0x2d   :  { %561 = vmatpush3.bf16.msra.mxu0 %v560_v58 }
  0x2e   :  { %593 = vmatpush3.bf16.msra.mxu1 %v592_v61 }
  0xe2   :  { %v134_v9 = vpop.f32.mrb[0].mxu0 }
  0xe3   :  { %v135_v10 = vadd.f32 %v134_v9, %v47_v5  ;;  %v205_v11 = vpop.f32.mrb[0].mxu1  ;;  %v136_v12 = vpop.f32.mrb[1].mxu0 }
  0xe4   :  { %v206_v13 = vadd.f32 %v205_v11, %v55_v6  ;;  %v137_v14 = vadd.f32 %v136_v12, %v51_v7  ;;  %v207_v15 = vpop.f32.mrb[1].mxu1 }
  0xe5   :  { %v208_v16 = vadd.f32 %v207_v15, %v59_v8  ;;  %v210_v19 = vmax.f32 %v135_v10, 0.0 }
  0xe6   :  { %v212_v17 = vmax.f32 %v206_v13, 0.0  ;;  %v211_v18 = vmax.f32 %v137_v14, 0.0 }
  0xe7   :  { %v213_v20 = vmax.f32 %v208_v16, 0.0 }
  0xe8   :  { %349 = vmatprep.mubr.f32.mxu0 %v211_v18 }
  0xe9   :  { %419 = vmatprep.mubr.f32.mxu1 %v213_v20  ;;  %350 = vmatmul.mubr.f32.vlgmr.msra.gmra.mrb[2].mxu0 %v210_v19 }
  0xea   :  { %420 = vmatmul.mubr.f32.vlgmr.msra.gmra.mrb[2].mxu1 %v212_v17 }
 0x1bc   :  { %v476_v21 = vpop.f32.mrb[2].mxu0 }
 0x1bd   :  { %v511_v22 = vpop.f32.mrb[2].mxu1  ;;  %v477_v24 = vpop.f32.mrb[3].mxu0 }
 0x1be   :  { %v478_v25 = vadd.f32 %v477_v24, %v476_v21  ;;  %v512_v26 = vpop.f32.mrb[3].mxu1 }
 0x1bf   :  { %v513_v27 = vadd.f32 %v512_v26, %v511_v22 }
 0x1c0   :  { %v352_v28 = vadd.f32 %v478_v25, %v443_v23 }
 0x1c2   :  { %v422_v29 = vadd.f32 %v513_v27, %v352_v28 }
 0x1c4   :  { %426 = vst.msk [vmem:[#allocation2] sm:$0xff] %vm425_vm1, %v422_v29 }
 0x1c5   :  { %607 = shalt.err (!%p604_p4)
}
 0x1c6   :  { %s608_s9 = scalar_lea.hbm %s932_s5, 128 }
 0x1c7   :  { %p609_p5 = scmp.ne.s32.totalorder %s932_s5, %s608_s9  ;;  %p612_p6 = scmp.lt.u32.totalorder %s608_s9, %s932_s5 }
 0x1c9   :  { %p614_p7 = pnand %p612_p6, %p609_p5 }
 0x1cb   :  { %617 = shalt.err (!%p614_p7)
}
 0x1cc   :  { %436 = dma.vmem_to_hbm [thread:$0]  %s434_s6, 128, %s932_s5, [#allocation3]  }
 0x1cd   :  { %618 = dma.done.wait [#allocation3], 128  }
 0x1ce   :  { %619 = vsyncadd [#allocation3], 4294967168 }
 0x1cf   :  { %440 = vsyncpa [#allocation3], 1 }

</bundles_post_ra>
